<compile_context>
chip_gen: v5e
topology: v5e:2x2
jax: 0.10.0
libtpu: 0.0.40
codegen_flags: <defaults>
</compile_context>

<pallas_src>
import math

import jax
import jax.numpy as jnp
from jax.experimental import pallas as pl
from jax.experimental.pallas import tpu as pltpu

STREAM_DTYPE = jnp.bfloat16   # storage dtype of the streamed activations / weights


def _mxu_rowsum(x_f32, ones_ref_val):
    """Per-sample-segment row sum of an f32 array, on the MXU.

    The f32 operand is split into hi+lo bf16 parts so both MXU operands are
    bf16 (exact products, f32 accumulation) -> ~f32-accurate result independent
    of the backend's default f32 matmul precision."""
    hi = x_f32.astype(jnp.bfloat16)
    lo = (x_f32 - hi.astype(jnp.float32)).astype(jnp.bfloat16)
    return (jnp.dot(hi, ones_ref_val, preferred_element_type=jnp.float32)
            + jnp.dot(lo, ones_ref_val, preferred_element_type=jnp.float32))


def deepfm_kernel(x_ref, sel_ref, w1_ref, b1_ref, w2_ref, b2_ref,
                  onesD_ref, onesE_ref, onesH_ref, out_ref):
    # x_ref: (rows, P*D) bf16, P samples packed per 128-lane row.
    x_bf = x_ref[...]
    xf = x_bf.astype(jnp.float32)          # f32 only needed for the square term

    # ---- FM second order (per packed sample segment) ------------------------
    #   0.5 * ( sum_e (sum_f x_fe)^2  -  sum_{f,e} x_fe^2 )
    # Field sum via a constant block-diagonal 0/1 selection matmul; both row
    # reductions via constant block-diagonal ones matmuls (MXU, not XLU).
    sum_sq = _mxu_rowsum(xf * xf, onesD_ref[...])                            # (rows, P)
    sum_emb = jnp.dot(x_bf, sel_ref[...],
                      preferred_element_type=jnp.float32)                    # (rows, P*E)
    sum_emb_sq = _mxu_rowsum(sum_emb * sum_emb, onesE_ref[...])              # (rows, P)
    fm2 = 0.5 * (sum_emb_sq - sum_sq)

    # ---- Deep part: (Linear with eval-BN folded) -> ReLU, twice --------------
    # Block-diagonal weights keep the 4 packed samples independent.
    h = jnp.dot(x_bf, w1_ref[...], preferred_element_type=jnp.float32) + b1_ref[...]
    h = jnp.maximum(h, 0.0)
    h = jnp.dot(h.astype(x_bf.dtype), w2_ref[...],
                preferred_element_type=jnp.float32) + b2_ref[...]
    h = jnp.maximum(h, 0.0)                                                  # (rows, P*H2)
    deep_sum = _mxu_rowsum(h, onesH_ref[...])                                # (rows, P)

    # Pre-sigmoid partial logits. The first-order term, the global bias and the
    # sigmoid are applied in the wrapper on lane-dense (B,) vectors.
    out_ref[...] = fm2 + deep_sum


def _round_up(x, m):
    return (x + m - 1) // m * m


def deepfm_forward(X, params, tile_b=8192):
    """X: (B, field_size) float array of raw indices into the concatenated
    embedding table (same convention as the PyTorch forward: X.long()).

    tile_b is the number of samples per grid step (default 8192; the kernel
    streams ~66 B/sample, so this is ~0.5 MiB/step of bf16 activations and the
    per-tile VMEM footprint stays well under the explicit 32 MiB limit on
    v5e/v6e/v7x)."""
    B, F = X.shape
    E = params["emb2"].shape[1]
    D = F * E
    H1 = params["w1t"].shape[1]
    H2 = params["w2t"].shape[1]

    # samples packed per 128-lane row
    P = 128 // D if (D <= 128 and 128 % D == 0) else 1
    W = P * D
    spt = 8 * P                                  # sample granularity of a tile

    # ---- batch tiling --------------------------------------------------------
    tb = min(tile_b, _round_up(B, spt))
    tb = _round_up(tb, spt)
    # keep the grid >= 2 steps when reasonable so both v7x TensorCores get work
    if tb >= B and B >= 2 * spt:
        tb = _round_up((B + 1) // 2, spt)
    Bp = _round_up(B, tb)
    grid = (Bp // tb,)
    rows_per_tile = tb // P

    # ---- glue in plain JAX: single merged gather + packing + BN folding ------
    Xi = X.astype(jnp.int32)                      # == X.long()
    if Bp != B:
        # pad the cheap index matrix (32 B/row), never the big activation array;
        # index 0 is a valid row of the table, padded samples are sliced off.
        Xi = jnp.pad(Xi, ((0, Bp - B), (0, 0)))
    table = jnp.concatenate([params["emb2"], params["emb1"]], axis=1)   # (feat, E+1)
    g = table[Xi.reshape(-1)].reshape(Bp, F, E + 1)
    fo_sum = jnp.sum(g[:B, :, E], axis=1)                               # (B,) f32
    x_packed = g[:, :, :E].reshape(Bp // P, W).astype(STREAM_DTYPE)     # (Bp/P, P*D)

    # eval-mode BN folded into the Linear layers: y = (xW + b) * s + sh
    w1f = params["w1t"] * params["s1"]                                  # (D, H1)
    b1f = params["b1"] * params["s1"] + params["sh1"]                   # (1, H1)
    w2f = params["w2t"] * params["s2"]                                  # (H1, H2)
    b2f = params["b2"] * params["s2"] + params["sh2"]                   # (1, H2)

    # block-diagonal per-sample constants
    eyeP = jnp.eye(P, dtype=jnp.float32)
    sel = jnp.tile(jnp.eye(E, dtype=jnp.float32), (F, 1))               # (D, E)
    sel_b = jnp.kron(eyeP, sel).astype(STREAM_DTYPE)                    # (P*D, P*E)
    w1_b = jnp.kron(eyeP, w1f).astype(STREAM_DTYPE)                     # (P*D, P*H1)
    w2_b = jnp.kron(eyeP, w2f).astype(STREAM_DTYPE)                     # (P*H1, P*H2)
    b1_b = jnp.tile(b1f, (1, P)).astype(jnp.float32)                    # (1, P*H1)
    b2_b = jnp.tile(b2f, (1, P)).astype(jnp.float32)                    # (1, P*H2)
    onesD = jnp.kron(eyeP, jnp.ones((D, 1), jnp.float32)).astype(STREAM_DTYPE)   # (P*D, P)
    onesE = jnp.kron(eyeP, jnp.ones((E, 1), jnp.float32)).astype(STREAM_DTYPE)   # (P*E, P)
    onesH = jnp.kron(eyeP, jnp.ones((H2, 1), jnp.float32)).astype(STREAM_DTYPE)  # (P*H2, P)

    batch_in = pl.BlockSpec((rows_per_tile, W), lambda i: (i, 0))
    batch_out = pl.BlockSpec((rows_per_tile, P), lambda i: (i, 0))
    const = lambda shape: pl.BlockSpec(shape, lambda i: (0, 0))

    partial = pl.pallas_call(
        deepfm_kernel,
        out_shape=jax.ShapeDtypeStruct((Bp // P, P), jnp.float32),
        grid=grid,
        in_specs=[
            batch_in,                 # packed second-order activations (bf16)
            const((P * D, P * E)),    # block-diag field-sum selection
            const((P * D, P * H1)),   # w1 (BN folded, block-diag, bf16)
            const((1, P * H1)),       # b1 (BN folded, tiled)
            const((P * H1, P * H2)),  # w2 (BN folded, block-diag, bf16)
            const((1, P * H2)),       # b2 (BN folded, tiled)
            const((P * D, P)),        # block-diag ones for sum(x^2)
            const((P * E, P)),        # block-diag ones for sum(sum_emb^2)
            const((P * H2, P)),       # block-diag ones for sum(h)
        ],
        out_specs=batch_out,
        compiler_params=pltpu.CompilerParams(
            dimension_semantics=("parallel",),
            vmem_limit_bytes=32 * 1024 * 1024),
    )(x_packed, sel_b, w1_b, b1_b, w2_b, b2_b, onesD, onesE, onesH)

    # first-order term, bias and sigmoid on lane-dense (B,) vectors in XLA
    logits = partial.reshape(Bp)[:B] + fo_sum + params["bias"][0]
    return jax.nn.sigmoid(logits)


def deepfm_ref(X, params, match_kernel_precision=False):
    """Pure-JAX reference mirroring the PyTorch forward (eval mode).
    With match_kernel_precision=True it applies the same bf16 storage / bf16
    MXU-operand choices made by the kernel for an apples-to-apples check."""
    B, F = X.shape
    E = params["emb2"].shape[1]
    idx = X.astype(jnp.int32).reshape(-1)
    fo_sum = jnp.sum(params["emb1"][idx].reshape(B, F), axis=1)
    so = params["emb2"][idx].reshape(B, F, E)

    w1f = params["w1t"] * params["s1"]
    b1f = params["b1"] * params["s1"] + params["sh1"]
    w2f = params["w2t"] * params["s2"]
    b2f = params["b2"] * params["s2"] + params["sh2"]

    if match_kernel_precision:
        x_bf = so.reshape(B, F * E).astype(jnp.bfloat16)
        so_f = x_bf.astype(jnp.float32).reshape(B, F, E)
        sum_emb = jnp.sum(so_f, axis=1)
        fm2 = 0.5 * (jnp.sum(sum_emb * sum_emb, axis=1)
                     - jnp.sum(so_f * so_f, axis=(1, 2)))
        h = jnp.dot(x_bf, w1f.astype(jnp.bfloat16),
                    preferred_element_type=jnp.float32) + b1f
        h = jnp.maximum(h, 0.0)
        h = jnp.dot(h.astype(jnp.bfloat16), w2f.astype(jnp.bfloat16),
                    preferred_element_type=jnp.float32) + b2f
        h = jnp.maximum(h, 0.0)
    else:
        x = so.reshape(B, F * E)
        sum_emb = jnp.sum(so, axis=1)
        fm2 = 0.5 * (jnp.sum(sum_emb * sum_emb, axis=1)
                     - jnp.sum(so * so, axis=(1, 2)))
        h = jnp.maximum(x @ w1f + b1f, 0.0)
        h = jnp.maximum(h @ w2f + b2f, 0.0)

    total = fo_sum + fm2 + jnp.sum(h, axis=1) + params["bias"][0]
    return jax.nn.sigmoid(total)


def init_params(key, field_size, feature_sizes, embedding_size, deep_layers):
    total_feat = sum(feature_sizes)
    stdv = math.sqrt(1.0 / len(feature_sizes))
    k = jax.random.split(key, 7)

    # fm first / second order embedding tables ~ N(0, stdv)
    emb1 = stdv * jax.random.normal(k[0], (total_feat, 1), jnp.float32)
    emb2 = stdv * jax.random.normal(k[1], (total_feat, embedding_size), jnp.float32)

    d_in = field_size * embedding_size
    h1, h2 = deep_layers
    lim1 = 1.0 / math.sqrt(d_in)
    w1 = jax.random.uniform(k[2], (h1, d_in), jnp.float32, -lim1, lim1)  # torch Linear layout (out, in)
    b1 = jax.random.uniform(k[3], (h1,), jnp.float32, -lim1, lim1)
    lim2 = 1.0 / math.sqrt(h1)
    w2 = jax.random.uniform(k[4], (h2, h1), jnp.float32, -lim2, lim2)
    b2 = jax.random.uniform(k[5], (h2,), jnp.float32, -lim2, lim2)
    bias = jax.random.normal(k[6], (1,), jnp.float32)                    # torch.randn(1)

    # BatchNorm1d eval mode, default stats: y = (x - 0)/sqrt(1+eps)*1 + 0
    eps = 1e-5
    s1 = jnp.full((1, h1), 1.0 / math.sqrt(1.0 + eps), jnp.float32)
    sh1 = jnp.zeros((1, h1), jnp.float32)
    s2 = jnp.full((1, h2), 1.0 / math.sqrt(1.0 + eps), jnp.float32)
    sh2 = jnp.zeros((1, h2), jnp.float32)

    return dict(
        emb1=emb1, emb2=emb2,
        w1t=w1.T, b1=b1.reshape(1, h1), s1=s1, sh1=sh1,
        w2t=w2.T, b2=b2.reshape(1, h2), s2=s2, sh2=sh2,
        bias=bias,
    )


if __name__ == "__main__":
    field_size = 8
    feature_sizes = [10, 20, 30, 40, 50, 60, 70, 80]   # sum = 360
    embedding_size = 4
    deep_layers = [32, 32]

    key = jax.random.PRNGKey(0)
    pkey, xkey1, xkey2 = jax.random.split(key, 3)
    params = init_params(pkey, field_size, feature_sizes, embedding_size, deep_layers)

    # --- small single-tile case (exercises the index-padding path, B < 32) -----
    B = 8
    X = jax.random.randint(xkey1, (B, field_size), 0, sum(feature_sizes)).astype(jnp.float32)
    out = jax.block_until_ready(deepfm_forward(X, params))
    assert out.shape == (B,)

    ref_match = deepfm_ref(X, params, match_kernel_precision=True)
    ref_f32 = deepfm_ref(X, params)
    assert jnp.allclose(out, ref_match, atol=2e-4, rtol=2e-4), (out, ref_match)
    assert jnp.allclose(out, ref_f32, atol=5e-2), (out, ref_f32)   # bf16-storage error bound

    # --- multi-tile case exercising the batch grid + ragged-B padding path ------
    B2 = 300
    X2 = jax.random.randint(xkey2, (B2, field_size), 0, sum(feature_sizes)).astype(jnp.float32)
    out2 = jax.block_until_ready(deepfm_forward(X2, params, tile_b=128))
    assert out2.shape == (B2,)
    ref2 = deepfm_ref(X2, params, match_kernel_precision=True)
    assert jnp.allclose(out2, ref2, atol=2e-4, rtol=2e-4), (out2, ref2)

    print("KERNEL_OK")
</pallas_src>

<mosaic_0001>
module attributes {stable_mosaic.version = 11 : i64} {
  func.func @deepfm_kernel(%arg0: i32, %arg1: memref<8x128xbf16, #tpu.memory_space<vmem>>, %arg2: memref<128x16xbf16, #tpu.memory_space<vmem>>, %arg3: memref<128x128xbf16, #tpu.memory_space<vmem>>, %arg4: memref<1x128xf32, #tpu.memory_space<vmem>>, %arg5: memref<128x128xbf16, #tpu.memory_space<vmem>>, %arg6: memref<1x128xf32, #tpu.memory_space<vmem>>, %arg7: memref<128x4xbf16, #tpu.memory_space<vmem>>, %arg8: memref<16x4xbf16, #tpu.memory_space<vmem>>, %arg9: memref<128x4xbf16, #tpu.memory_space<vmem>>, %arg10: memref<8x4xf32, #tpu.memory_space<vmem>>) attributes {dimension_semantics = [#tpu.dimension_semantics<parallel>], iteration_bounds = array<i64: 1>, scalar_prefetch = 0 : i64, scratch_operands = 0 : i64, tpu.core_type = #tpu.core_type<tc>, window_params = [{transform_indices = @transform_0, window_bounds = array<i64: 8, 128>}, {pipeline_mode = #tpu.pipeline_mode<synchronous>, transform_indices = @transform_1, window_bounds = array<i64: 128, 16>}, {pipeline_mode = #tpu.pipeline_mode<synchronous>, transform_indices = @transform_2, window_bounds = array<i64: 128, 128>}, {pipeline_mode = #tpu.pipeline_mode<synchronous>, transform_indices = @transform_3, window_bounds = array<i64: 1, 128>}, {pipeline_mode = #tpu.pipeline_mode<synchronous>, transform_indices = @transform_4, window_bounds = array<i64: 128, 128>}, {pipeline_mode = #tpu.pipeline_mode<synchronous>, transform_indices = @transform_5, window_bounds = array<i64: 1, 128>}, {pipeline_mode = #tpu.pipeline_mode<synchronous>, transform_indices = @transform_6, window_bounds = array<i64: 128, 4>}, {pipeline_mode = #tpu.pipeline_mode<synchronous>, transform_indices = @transform_7, window_bounds = array<i64: 16, 4>}, {pipeline_mode = #tpu.pipeline_mode<synchronous>, transform_indices = @transform_8, window_bounds = array<i64: 128, 4>}, {transform_indices = @transform_9, window_bounds = array<i64: 8, 4>}]} {
    %c0 = arith.constant 0 : index
    %c0_0 = arith.constant 0 : index
    %0 = vector.load %arg1[%c0, %c0_0] : memref<8x128xbf16, #tpu.memory_space<vmem>>, vector<8x128xbf16>
    %1 = arith.extf %0 : vector<8x128xbf16> to vector<8x128xf32>
    %2 = arith.mulf %1, %1 : vector<8x128xf32>
    %c0_1 = arith.constant 0 : index
    %c0_2 = arith.constant 0 : index
    %3 = vector.load %arg7[%c0_1, %c0_2] : memref<128x4xbf16, #tpu.memory_space<vmem>>, vector<128x4xbf16>
    %4 = arith.truncf %2 : vector<8x128xf32> to vector<8x128xbf16>
    %5 = arith.extf %4 : vector<8x128xbf16> to vector<8x128xf32>
    %6 = arith.subf %2, %5 : vector<8x128xf32>
    %7 = arith.truncf %6 : vector<8x128xf32> to vector<8x128xbf16>
    %cst = arith.constant dense<0.000000e+00> : vector<8x4xf32>
    %8 = tpu.matmul %4, %3, %cst {dimension_numbers = #tpu.dot_dimension_numbers<[1], [0], [0], [1], [0, 0, 1, 1], [], []>} : vector<8x128xbf16>, vector<128x4xbf16>, vector<8x4xf32> -> vector<8x4xf32>
    %cst_3 = arith.constant dense<0.000000e+00> : vector<8x4xf32>
    %9 = tpu.matmul %7, %3, %cst_3 {dimension_numbers = #tpu.dot_dimension_numbers<[1], [0], [0], [1], [0, 0, 1, 1], [], []>} : vector<8x128xbf16>, vector<128x4xbf16>, vector<8x4xf32> -> vector<8x4xf32>
    %10 = arith.addf %8, %9 : vector<8x4xf32>
    %c0_4 = arith.constant 0 : index
    %c0_5 = arith.constant 0 : index
    %11 = vector.load %arg2[%c0_4, %c0_5] : memref<128x16xbf16, #tpu.memory_space<vmem>>, vector<128x16xbf16>
    %cst_6 = arith.constant dense<0.000000e+00> : vector<8x16xf32>
    %12 = tpu.matmul %0, %11, %cst_6 {dimension_numbers = #tpu.dot_dimension_numbers<[1], [0], [0], [1], [0, 0, 1, 1], [], []>} : vector<8x128xbf16>, vector<128x16xbf16>, vector<8x16xf32> -> vector<8x16xf32>
    %13 = arith.mulf %12, %12 : vector<8x16xf32>
    %c0_7 = arith.constant 0 : index
    %c0_8 = arith.constant 0 : index
    %14 = vector.load %arg8[%c0_7, %c0_8] : memref<16x4xbf16, #tpu.memory_space<vmem>>, vector<16x4xbf16>
    %15 = arith.truncf %13 : vector<8x16xf32> to vector<8x16xbf16>
    %16 = arith.extf %15 : vector<8x16xbf16> to vector<8x16xf32>
    %17 = arith.subf %13, %16 : vector<8x16xf32>
    %18 = arith.truncf %17 : vector<8x16xf32> to vector<8x16xbf16>
    %cst_9 = arith.constant dense<0.000000e+00> : vector<8x4xf32>
    %19 = tpu.matmul %15, %14, %cst_9 {dimension_numbers = #tpu.dot_dimension_numbers<[1], [0], [0], [1], [0, 0, 1, 1], [], []>} : vector<8x16xbf16>, vector<16x4xbf16>, vector<8x4xf32> -> vector<8x4xf32>
    %cst_10 = arith.constant dense<0.000000e+00> : vector<8x4xf32>
    %20 = tpu.matmul %18, %14, %cst_10 {dimension_numbers = #tpu.dot_dimension_numbers<[1], [0], [0], [1], [0, 0, 1, 1], [], []>} : vector<8x16xbf16>, vector<16x4xbf16>, vector<8x4xf32> -> vector<8x4xf32>
    %21 = arith.addf %19, %20 : vector<8x4xf32>
    %22 = arith.subf %21, %10 : vector<8x4xf32>
    %cst_11 = arith.constant 5.000000e-01 : f32
    %23 = vector.broadcast %cst_11 : f32 to vector<8x4xf32>
    %24 = arith.mulf %23, %22 : vector<8x4xf32>
    %c0_12 = arith.constant 0 : index
    %c0_13 = arith.constant 0 : index
    %25 = vector.load %arg3[%c0_12, %c0_13] : memref<128x128xbf16, #tpu.memory_space<vmem>>, vector<128x128xbf16>
    %cst_14 = arith.constant dense<0.000000e+00> : vector<8x128xf32>
    %26 = tpu.matmul %0, %25, %cst_14 {dimension_numbers = #tpu.dot_dimension_numbers<[1], [0], [0], [1], [0, 0, 1, 1], [], []>} : vector<8x128xbf16>, vector<128x128xbf16>, vector<8x128xf32> -> vector<8x128xf32>
    %c0_15 = arith.constant 0 : index
    %c0_16 = arith.constant 0 : index
    %27 = vector.load %arg4[%c0_15, %c0_16] : memref<1x128xf32, #tpu.memory_space<vmem>>, vector<1x128xf32>
    %28 = vector.broadcast %27 : vector<1x128xf32> to vector<8x128xf32>
    %29 = arith.addf %26, %28 : vector<8x128xf32>
    %cst_17 = arith.constant 0.000000e+00 : f32
    %30 = vector.broadcast %cst_17 : f32 to vector<8x128xf32>
    %31 = arith.maximumf %29, %30 : vector<8x128xf32>
    %32 = arith.truncf %31 : vector<8x128xf32> to vector<8x128xbf16>
    %c0_18 = arith.constant 0 : index
    %c0_19 = arith.constant 0 : index
    %33 = vector.load %arg5[%c0_18, %c0_19] : memref<128x128xbf16, #tpu.memory_space<vmem>>, vector<128x128xbf16>
    %cst_20 = arith.constant dense<0.000000e+00> : vector<8x128xf32>
    %34 = tpu.matmul %32, %33, %cst_20 {dimension_numbers = #tpu.dot_dimension_numbers<[1], [0], [0], [1], [0, 0, 1, 1], [], []>} : vector<8x128xbf16>, vector<128x128xbf16>, vector<8x128xf32> -> vector<8x128xf32>
    %c0_21 = arith.constant 0 : index
    %c0_22 = arith.constant 0 : index
    %35 = vector.load %arg6[%c0_21, %c0_22] : memref<1x128xf32, #tpu.memory_space<vmem>>, vector<1x128xf32>
    %36 = vector.broadcast %35 : vector<1x128xf32> to vector<8x128xf32>
    %37 = arith.addf %34, %36 : vector<8x128xf32>
    %cst_23 = arith.constant 0.000000e+00 : f32
    %38 = vector.broadcast %cst_23 : f32 to vector<8x128xf32>
    %39 = arith.maximumf %37, %38 : vector<8x128xf32>
    %c0_24 = arith.constant 0 : index
    %c0_25 = arith.constant 0 : index
    %40 = vector.load %arg9[%c0_24, %c0_25] : memref<128x4xbf16, #tpu.memory_space<vmem>>, vector<128x4xbf16>
    %41 = arith.truncf %39 : vector<8x128xf32> to vector<8x128xbf16>
    %42 = arith.extf %41 : vector<8x128xbf16> to vector<8x128xf32>
    %43 = arith.subf %39, %42 : vector<8x128xf32>
    %44 = arith.truncf %43 : vector<8x128xf32> to vector<8x128xbf16>
    %cst_26 = arith.constant dense<0.000000e+00> : vector<8x4xf32>
    %45 = tpu.matmul %41, %40, %cst_26 {dimension_numbers = #tpu.dot_dimension_numbers<[1], [0], [0], [1], [0, 0, 1, 1], [], []>} : vector<8x128xbf16>, vector<128x4xbf16>, vector<8x4xf32> -> vector<8x4xf32>
    %cst_27 = arith.constant dense<0.000000e+00> : vector<8x4xf32>
    %46 = tpu.matmul %44, %40, %cst_27 {dimension_numbers = #tpu.dot_dimension_numbers<[1], [0], [0], [1], [0, 0, 1, 1], [], []>} : vector<8x128xbf16>, vector<128x4xbf16>, vector<8x4xf32> -> vector<8x4xf32>
    %47 = arith.addf %45, %46 : vector<8x4xf32>
    %48 = arith.addf %24, %47 : vector<8x4xf32>
    %c0_28 = arith.constant 0 : index
    %c0_29 = arith.constant 0 : index
    %49 = vector.load %arg10[%c0_28, %c0_29] : memref<8x4xf32, #tpu.memory_space<vmem>>, vector<8x4xf32>
    tpu.vector_store %arg10[%c0_28, %c0_29], %48 {strides = array<i32>} : memref<8x4xf32, #tpu.memory_space<vmem>>, vector<8x4xf32>,
    return
  }
  func.func @transform_0(%arg0: i32) -> (i32, i32) {
    %c0_i32 = arith.constant 0 : i32
    %c0_i32_0 = arith.constant 0 : i32
    return %arg0, %c0_i32 : i32, i32
  }
  func.func @transform_1(%arg0: i32) -> (i32, i32) {
    %c0_i32 = arith.constant 0 : i32
    %c0_i32_0 = arith.constant 0 : i32
    %c0_i32_1 = arith.constant 0 : i32
    return %c0_i32, %c0_i32_0 : i32, i32
  }
  func.func @transform_2(%arg0: i32) -> (i32, i32) {
    %c0_i32 = arith.constant 0 : i32
    %c0_i32_0 = arith.constant 0 : i32
    %c0_i32_1 = arith.constant 0 : i32
    return %c0_i32, %c0_i32_0 : i32, i32
  }
  func.func @transform_3(%arg0: i32) -> (i32, i32) {
    %c0_i32 = arith.constant 0 : i32
    %c0_i32_0 = arith.constant 0 : i32
    %c0_i32_1 = arith.constant 0 : i32
    return %c0_i32, %c0_i32_0 : i32, i32
  }
  func.func @transform_4(%arg0: i32) -> (i32, i32) {
    %c0_i32 = arith.constant 0 : i32
    %c0_i32_0 = arith.constant 0 : i32
    %c0_i32_1 = arith.constant 0 : i32
    return %c0_i32, %c0_i32_0 : i32, i32
  }
  func.func @transform_5(%arg0: i32) -> (i32, i32) {
    %c0_i32 = arith.constant 0 : i32
    %c0_i32_0 = arith.constant 0 : i32
    %c0_i32_1 = arith.constant 0 : i32
    return %c0_i32, %c0_i32_0 : i32, i32
  }
  func.func @transform_6(%arg0: i32) -> (i32, i32) {
    %c0_i32 = arith.constant 0 : i32
    %c0_i32_0 = arith.constant 0 : i32
    %c0_i32_1 = arith.constant 0 : i32
    return %c0_i32, %c0_i32_0 : i32, i32
  }
  func.func @transform_7(%arg0: i32) -> (i32, i32) {
    %c0_i32 = arith.constant 0 : i32
    %c0_i32_0 = arith.constant 0 : i32
    %c0_i32_1 = arith.constant 0 : i32
    return %c0_i32, %c0_i32_0 : i32, i32
  }
  func.func @transform_8(%arg0: i32) -> (i32, i32) {
    %c0_i32 = arith.constant 0 : i32
    %c0_i32_0 = arith.constant 0 : i32
    %c0_i32_1 = arith.constant 0 : i32
    return %c0_i32, %c0_i32_0 : i32, i32
  }
  func.func @transform_9(%arg0: i32) -> (i32, i32) {
    %c0_i32 = arith.constant 0 : i32
    %c0_i32_0 = arith.constant 0 : i32
    return %arg0, %c0_i32 : i32, i32
  }
}

</mosaic_0001>

<bundles_post_ra>
// kernel: tpu_custom_call.1
= control target key start
LH: loop header
LB: loop body
LE: loop exit
PB: predicated region body
PF: predicated region fallthrough
CT: control target
= control target key end

     0   :  { %vm220_vm0 = vcmask 130048   ;;  %vm515_vm1 = vcmask 31744   ;;  %s923_s1 = inlined_call_operand.vmem [shape: bf16[128,16], index: 1, kind: input, shape index: {}]   ;;  %s924_s0 = inlined_call_operand.vmem [shape: bf16[8,128], index: 0, kind: input, shape index: {}]   ;;  %s925_s6 = inlined_call_operand.vmem [shape: bf16[128,4], index: 6, kind: input, shape index: {}]   ;;  %s926_s7 = inlined_call_operand.vmem [shape: bf16[16,4], index: 7, kind: input, shape index: {}]   ;;  %s927_s2 = inlined_call_operand.vmem [shape: bf16[128,128], index: 2, kind: input, shape index: {}]   ;;  %s928_s3 = inlined_call_operand.vmem [shape: f32[1,128], index: 3, kind: input, shape index: {}]   ;;  %s929_s5 = inlined_call_operand.vmem [shape: f32[1,128], index: 5, kind: input, shape index: {}]   ;;  %s930_s4 = inlined_call_operand.vmem [shape: bf16[128,128], index: 4, kind: input, shape index: {}]   ;;  %s931_s8 = inlined_call_operand.vmem [shape: bf16[128,4], index: 8, kind: input, shape index: {}]   ;;  %s932_s9 = inlined_call_operand.vmem [shape: f32[8,4], index: 9, kind: output, shape index: {}]  }
   0x1   :  { %v702_v0 = vld [vmem:[%s923_s1 + $0x38] sm:$0xff]  ;;  %v701_v1 = vld [vmem:[%s923_s1 + $0x30] sm:$0xff]  ;;  %v700_v2 = vld [vmem:[%s923_s1 + $0x28] sm:$0xff] }
   0x2   :  { %194 = vmatpush.bf16.msra.mxu2 %v702_v0  ;;  %v699_v3 = vld [vmem:[%s923_s1 + $0x20] sm:$0xff]  ;;  %v698_v4 = vld [vmem:[%s923_s1 + $0x18] sm:$0xff]  ;;  %v697_v5 = vld [vmem:[%s923_s1 + $0x10] sm:$0xff] }
   0x3   :  { %v696_v6 = vld [vmem:[%s923_s1 + $0x8] sm:$0xff]  ;;  %v695_v7 = vld [vmem:[%s923_s1] sm:$0xff]  ;;  %v694_v9 = vld [vmem:[%s925_s6 + $0x38] sm:$0xff] }
   0x4   :  { %v807_v8 = vld [vmem:[%s924_s0] sm:$0xf]  ;;  %104 = vmatpush.bf16.msra.mxu0 %v694_v9  ;;  %117 = vmatpush.bf16.msra.mxu1 %v694_v9  ;;  %v693_v10 = vld [vmem:[%s925_s6 + $0x30] sm:$0xff]  ;;  %v692_v12 = vld [vmem:[%s925_s6 + $0x28] sm:$0xff] }
   0x5   :  { %v703_v11 = vld [vmem:[%s926_s7] sm:$0xff]  ;;  %v690_v14 = vld [vmem:[%s925_s6 + $0x18] sm:$0xff]  ;;  %v34_v15 = vunpack.c.l.bf16 %v807_v8  ;;  %v689_v16 = vld [vmem:[%s925_s6 + $0x10] sm:$0xff] }
   0x6   :  { %195 = vmatpush.bf16.msra.mxu2 %v701_v1  ;;  %231 = vmatpush.bf16.msra.mxu3 %v703_v11  ;;  %v691_v13 = vld [vmem:[%s925_s6 + $0x20] sm:$0xff]  ;;  %v688_v18 = vld [vmem:[%s925_s6 + $0x8] sm:$0xff]  ;;  %v711_v30 = vld [vmem:[%s927_s2 + $0x38] sm:$0xff] }
   0x7   :  { %v35_v17 = vmul.f32 %v34_v15, %v34_v15  ;;  %v687_v21 = vld [vmem:[%s925_s6] sm:$0xff]  ;;  %v710_v32 = vld [vmem:[%s927_s2 + $0x30] sm:$0xff]  ;;  %v709_v33 = vld [vmem:[%s927_s2 + $0x28] sm:$0xff] }
   0x8   :  { %105 = vmatpush.bf16.msra.mxu0 %v693_v10  ;;  %118 = vmatpush.bf16.msra.mxu1 %v693_v10  ;;  %v708_v34 = vld [vmem:[%s927_s2 + $0x20] sm:$0xff]  ;;  %v707_v35 = vld [vmem:[%s927_s2 + $0x18] sm:$0xff]  ;;  %v706_v36 = vld [vmem:[%s927_s2 + $0x10] sm:$0xff] }
   0x9   :  { %v52_v19 = vpack.c.bf16 %v35_v17, %v35_v17  ;;  %v705_v37 = vld [vmem:[%s927_s2 + $0x8] sm:$0xff]  ;;  %v704_v38 = vld [vmem:[%s927_s2] sm:$0xff]  ;;  %v719_v39 = vld [vmem:[%s930_s4 + $0x38] sm:$0xff] }
   0xa   :  { %196 = vmatpush.bf16.msra.mxu2 %v700_v2  ;;  %247 = vmatpush.bf16.msrb.mxu3 %v703_v11  ;;  %v718_v40 = vld [vmem:[%s930_s4 + $0x30] sm:$0xff]  ;;  %v717_v41 = vld [vmem:[%s930_s4 + $0x28] sm:$0xff]  ;;  %v716_v45 = vld [vmem:[%s930_s4 + $0x20] sm:$0xff] }
   0xb   :  { %v53_v20 = vunpack.c.l.bf16 %v52_v19  ;;  %v715_v46 = vld [vmem:[%s930_s4 + $0x18] sm:$0xff]  ;;  %v714_v47 = vld [vmem:[%s930_s4 + $0x10] sm:$0xff]  ;;  %v713_v50 = vld [vmem:[%s930_s4 + $0x8] sm:$0xff] }
   0xc   :  { %106 = vmatpush.bf16.msra.mxu0 %v692_v12  ;;  %119 = vmatpush.bf16.msra.mxu1 %v692_v12  ;;  %v712_v52 = vld [vmem:[%s930_s4] sm:$0xff]  ;;  %v727_v54 = vld [vmem:[%s931_s8 + $0x38] sm:$0xff]  ;;  %v726_v55 = vld [vmem:[%s931_s8 + $0x30] sm:$0xff] }
   0xd   :  { %v54_v22 = vsub.f32 %v35_v17, %v53_v20  ;;  %v725_v56 = vld [vmem:[%s931_s8 + $0x28] sm:$0xff]  ;;  %v724_v59 = vld [vmem:[%s931_s8 + $0x20] sm:$0xff]  ;;  %v723_v61 = vld [vmem:[%s931_s8 + $0x18] sm:$0xff] }
   0xe   :  { %197 = vmatpush.bf16.msra.mxu2 %v699_v3  ;;  %v722_v63 = vld [vmem:[%s931_s8 + $0x10] sm:$0xff]  ;;  %v728_v0 = vld [vmem:[%s928_s3] ss:$0 sm:$0xff] }
   0xf   :  { %v55_v23 = vpack.c.bf16 %v54_v22, %v54_v22 }
  0x10   :  { %107 = vmatpush.bf16.msra.mxu0 %v691_v13  ;;  %120 = vmatpush.bf16.msra.mxu1 %v691_v13 }
  0x12   :  { %198 = vmatpush.bf16.msra.mxu2 %v698_v4 }
  0x14   :  { %108 = vmatpush.bf16.msra.mxu0 %v690_v14  ;;  %121 = vmatpush.bf16.msra.mxu1 %v690_v14 }
  0x16   :  { %199 = vmatpush.bf16.msra.mxu2 %v697_v5 }
  0x18   :  { %109 = vmatpush.bf16.msra.mxu0 %v689_v16  ;;  %122 = vmatpush.bf16.msra.mxu1 %v689_v16 }
  0x1a   :  { %200 = vmatpush.bf16.msra.mxu2 %v696_v6  ;;  %v721_v6 = vld [vmem:[%s931_s8 + $0x8] sm:$0xff] }
  0x1c   :  { %110 = vmatpush.bf16.msra.mxu0 %v688_v18  ;;  %123 = vmatpush.bf16.msra.mxu1 %v688_v18 }
  0x1e   :  { %201 = vmatpush.bf16.msra.mxu2 %v695_v7  ;;  %v720_v7 = vld [vmem:[%s931_s8] sm:$0xff] }
  0x20   :  { %111 = vmatpush.bf16.msra.mxu0 %v687_v21  ;;  %124 = vmatpush.bf16.msra.mxu1 %v687_v21 }
  0x21   :  { %202 = vmatmul.bf16.vlgmr.msra.gmra.mxu2 %v807_v8 }
  0x22   :  { %501 = vmatpush.bf16.msrb.mxu2 %v727_v54 }
  0x23   :  { %112 = vmatmul.bf16.vlgmr.msra.gmra.mxu0 %v55_v23  ;;  %125 = vmatmul.bf16.vlgmr.msra.gmra.mxu1 %v52_v19 }
  0x24   :  { %406 = vmatpush.bf16.msrb.mxu0 %v719_v39  ;;  %488 = vmatpush.bf16.msrb.mxu1 %v727_v54 }
  0x26   :  { %502 = vmatpush.bf16.msrb.mxu2 %v726_v55 }
  0x28   :  { %407 = vmatpush.bf16.msrb.mxu0 %v718_v40  ;;  %489 = vmatpush.bf16.msrb.mxu1 %v726_v55 }
  0x2a   :  { %503 = vmatpush.bf16.msrb.mxu2 %v725_v56 }
  0x2c   :  { %408 = vmatpush.bf16.msrb.mxu0 %v717_v41  ;;  %490 = vmatpush.bf16.msrb.mxu1 %v725_v56 }
  0x2e   :  { %504 = vmatpush.bf16.msrb.mxu2 %v724_v59 }
  0x30   :  { %409 = vmatpush.bf16.msrb.mxu0 %v716_v45  ;;  %491 = vmatpush.bf16.msrb.mxu1 %v724_v59 }
  0x32   :  { %505 = vmatpush.bf16.msrb.mxu2 %v723_v61 }
  0x34   :  { %410 = vmatpush.bf16.msrb.mxu0 %v715_v46  ;;  %492 = vmatpush.bf16.msrb.mxu1 %v723_v61 }
  0x36   :  { %506 = vmatpush.bf16.msrb.mxu2 %v722_v63 }
  0x38   :  { %411 = vmatpush.bf16.msrb.mxu0 %v714_v47  ;;  %493 = vmatpush.bf16.msrb.mxu1 %v722_v63 }
  0x3a   :  { %507 = vmatpush.bf16.msrb.mxu2 %v721_v6 }
  0x3c   :  { %412 = vmatpush.bf16.msrb.mxu0 %v713_v50  ;;  %494 = vmatpush.bf16.msrb.mxu1 %v721_v6 }
  0x3e   :  { %508 = vmatpush.bf16.msrb.mxu2 %v720_v7 }
  0x40   :  { %413 = vmatpush.bf16.msrb.mxu0 %v712_v52  ;;  %495 = vmatpush.bf16.msrb.mxu1 %v720_v7 }
  0xa0   :  { %v113_v42 = vpop.f32.mrf.mxu0  ;;  %v126_v43 = vpop.f32.mrf.mxu1 }
  0xa1   :  { %v872_v44 = vadd.f32 %v126_v43, %v113_v42 }
  0xa4   :  { %v203_v24 = vpop.f32.mrf.mxu2 }
  0xa5   :  { %v207_v25 = vmul.f32 %v203_v24, %v203_v24 }
  0xa7   :  { %v210_v26 = vpack.c.bf16 %v207_v25, %v207_v25 }
  0xa8   :  { %v115_v48 = vpop.f32.mrf.mxu0  ;;  %v128_v49 = vpop.f32.mrf.mxu1 }
  0xa9   :  { %v211_v27 = vunpack.c.l.bf16 %v210_v26 }
  0xab   :  { %v212_v28 = vsub.f32 %v207_v25, %v211_v27 }
  0xac   :  { %v205_v29 = vpop.f32.mrf.mxu2 }
  0xad   :  { %v213_v31 = vpack.c.bf16 %v212_v28, %v212_v28 }
  0xaf   :  { %589 = vmatmul.msk.bf16.vlgmr.msra.gmra.mxu3 %vm220_vm0, %v213_v31 }
  0xb0   :  { %323 = vmatpush.bf16.msra.mxu3 %v711_v30 }
  0xb4   :  { %324 = vmatpush.bf16.msra.mxu3 %v710_v32 }
  0xb8   :  { %325 = vmatpush.bf16.msra.mxu3 %v709_v33 }
  0xbc   :  { %326 = vmatpush.bf16.msra.mxu3 %v708_v34 }
  0xbf   :  { %590 = vmatmul.msk.bf16.vlgmr.msrb.gmra.mxu3 %vm220_vm0, %v210_v26 }
  0xc0   :  { %327 = vmatpush.bf16.msra.mxu3 %v707_v35 }
  0xc4   :  { %328 = vmatpush.bf16.msra.mxu3 %v706_v36 }
  0xc8   :  { %329 = vmatpush.bf16.msra.mxu3 %v705_v37 }
  0xcc   :  { %330 = vmatpush.bf16.msra.mxu3 %v704_v38 }
  0xcf   :  { %331 = vmatmul.bf16.vlgmr.msra.gmra.mxu3 %v807_v8  ;;  %v729_v8 = vld [vmem:[%s929_s5] ss:$0 sm:$0xff] }
 0x132   :  { %v233_v51 = vpop.f32.mrf.mxu3 }
 0x13a   :  { %v235_v53 = vpop.f32.mrf.mxu3 }
 0x142   :  { %v249_v57 = vpop.f32.mrf.mxu3 }
 0x143   :  { %v250_v58 = vadd.f32 %v249_v57, %v233_v51 }
 0x145   :  { %v253_v60 = vsub.f32 %v250_v58, %v872_v44 }
 0x147   :  { %v254_v19 = vmul.f32 0.5, %v253_v60 }
 0x14a   :  { %v251_v62 = vpop.f32.mrf.mxu3 }
 0x152   :  { %v332_v1 = vpop.f32.mrf.mxu3 }
 0x153   :  { %v333_v2 = vadd.f32 %v728_v0, %v332_v1 }
 0x155   :  { %v336_v3 = vmax.f32 %v333_v2, 0.0 }
 0x157   :  { %v337_v4 = vpack.c.bf16 %v336_v3, %v336_v3 }
 0x159   :  { %414 = vmatmul.bf16.vlgmr.msrb.gmra.mxu0 %v337_v4 }
 0x15a   :  { %v334_v5 = vpop.f32.mrf.mxu3 }
 0x1d6   :  { %v415_v9 = vpop.f32.mrf.mxu0 }
 0x1d7   :  { %v416_v10 = vadd.f32 %v729_v8, %v415_v9 }
 0x1d9   :  { %v419_v11 = vmax.f32 %v416_v10, 0.0 }
 0x1db   :  { %v436_v12 = vpack.c.bf16 %v419_v11, %v419_v11 }
 0x1dd   :  { %v437_v13 = vunpack.c.l.bf16 %v436_v12  ;;  %509 = vmatmul.bf16.vlgmr.msrb.gmra.mxu2 %v436_v12 }
 0x1de   :  { %v417_v14 = vpop.f32.mrf.mxu0 }
 0x1df   :  { %v438_v15 = vsub.f32 %v419_v11, %v437_v13 }
 0x1e1   :  { %v439_v16 = vpack.c.bf16 %v438_v15, %v438_v15 }
 0x1e3   :  { %496 = vmatmul.bf16.vlgmr.msrb.gmra.mxu1 %v439_v16 }
 0x260   :  { %v497_v17 = vpop.f32.mrf.mxu1  ;;  %v510_v18 = vpop.f32.mrf.mxu2 }
 0x261   :  { %v511_v20 = vadd.f32 %v510_v18, %v497_v17 }
 0x263   :  { %v514_v21 = vadd.f32 %v511_v20, %v254_v19 }
 0x265   :  { %516 = vst.msk [vmem:[%s932_s9] sm:$0xff] %vm515_vm1, %v514_v21 }
 0x268   :  { %v499_v22 = vpop.f32.mrf.mxu1  ;;  %v512_v23 = vpop.f32.mrf.mxu2 }

</bundles_post_ra>
